<compile_context>
chip_gen: v7x
topology: tpu7x:2x2x1
jax: 0.10.0
libtpu: 0.0.40
codegen_flags: <defaults>
</compile_context>

<pallas_src>
import functools

import jax
import jax.numpy as jnp
from jax.experimental import pallas as pl
from jax.experimental.pallas import tpu as pltpu

_EPS = 1e-5
_LANE = 128          # pad feature / class dims to full vregs
_SUBLANE = 8         # pad the embedding-row count for clean reshapes
_TARGET_ROWS = 2048  # pair rows per grid block (feedback: 1024-4096)


def _round_up(x, m):
    return (x + m - 1) // m * m


def _vmem_limit_bytes():
    """~70% of physical per-core VMEM (v7x: ~45MiB, v5e/v6e: ~89MiB)."""
    try:
        info = pltpu.get_tpu_info()
        cap = int(getattr(info, "vmem_capacity_bytes", 0) or 0)
        if cap > 0:
            return int(cap * 0.7)
    except Exception:
        pass
    return 48 * 1024 * 1024


def _pick_row_tile(np_pad):
    """Largest divisor of np_pad whose block (<= _TARGET_ROWS pair rows)."""
    best = 1
    for cand in range(1, np_pad + 1):
        if np_pad % cand == 0 and cand * np_pad <= _TARGET_ROWS:
            best = cand
    return best


# ----------------------------------------------------------------------------
# Shared math helpers (pure jnp -> usable in kernels and in the JAX mirror)
# ----------------------------------------------------------------------------
def _bn_relu(h, gamma, beta, inv_b):
    """Training-mode BatchNorm1d (biased batch var) fused with ReLU."""
    mean = jnp.sum(h, axis=0, keepdims=True) * inv_b
    var = jnp.maximum(
        jnp.sum(h * h, axis=0, keepdims=True) * inv_b - mean * mean, 0.0)
    scale = gamma * jax.lax.rsqrt(var + _EPS)
    return jnp.maximum(h * scale + (beta - mean * scale), 0.0)


# ----------------------------------------------------------------------------
# Kernels
# ----------------------------------------------------------------------------
def _pairs_kernel(embs_ref, w1b_ref, w1r_ref, g1_ref, b1_ref, w2_ref,
                  g2_ref, b2_ref, w3_ref, b3_ref, o_ref,
                  a_scr, r_scr, sc1_scr, sh1_scr, sum2_scr, ssq2_scr,
                  *, n_valid):
    """All-pairs path. grid = (pass, row_tile); pass 0 = BN2 stats, 1 = apply."""
    p = pl.program_id(0)
    t = pl.program_id(1)
    np_pad = r_scr.shape[0]
    dp = a_scr.shape[1]
    ti = o_ref.shape[0] // np_pad     # i-rows of embs handled by this block

    # ---- once, at the very first grid step: fc1 halves + analytic BN1 -------
    @pl.when((p == 0) & (t == 0))
    def _init():
        e = embs_ref[...].astype(jnp.bfloat16)
        a = jnp.dot(e, w1b_ref[...], preferred_element_type=jnp.float32)
        r = jnp.dot(e, w1r_ref[...], preferred_element_type=jnp.float32)
        a_scr[...] = a
        r_scr[...] = r
        # Padded embedding rows are exactly zero, so plain sums / n_valid give
        # the stats over the valid rows only.  Over the NxN product grid:
        #   mean(h1) = mean(a) + mean(r),  var(h1) = var(a) + var(r).
        inv_n = 1.0 / float(n_valid)
        am = jnp.sum(a, axis=0, keepdims=True) * inv_n
        rm = jnp.sum(r, axis=0, keepdims=True) * inv_n
        av = jnp.sum(a * a, axis=0, keepdims=True) * inv_n - am * am
        rv = jnp.sum(r * r, axis=0, keepdims=True) * inv_n - rm * rm
        scale1 = g1_ref[...] * jax.lax.rsqrt(jnp.maximum(av + rv, 0.0) + _EPS)
        sc1_scr[...] = scale1
        sh1_scr[...] = b1_ref[...] - (am + rm) * scale1
        sum2_scr[...] = jnp.zeros_like(sum2_scr)
        ssq2_scr[...] = jnp.zeros_like(ssq2_scr)

    # ---- per tile (both passes): h2 = fc2(relu(bn1(h1))) --------------------
    start = pl.multiple_of(t * ti, ti)
    a_blk = a_scr[pl.ds(start, ti), :]                         # (ti, Dp)
    h1 = a_blk[:, None, :] + r_scr[...][None, :, :]            # (ti, Np, Dp)
    h1 = jnp.maximum(h1 * sc1_scr[...] + sh1_scr[...], 0.0)
    if n_valid < np_pad:  # static branch: zero out padded (i, j) pair rows
        gi = t * ti + jax.lax.broadcasted_iota(jnp.int32, (ti, np_pad, 1), 0)
        gj = jax.lax.broadcasted_iota(jnp.int32, (ti, np_pad, 1), 1)
        h1 = jnp.where((gi < n_valid) & (gj < n_valid), h1, 0.0)
    h1 = h1.reshape(ti * np_pad, dp).astype(jnp.bfloat16)
    h2 = jnp.dot(h1, w2_ref[...], preferred_element_type=jnp.float32)

    @pl.when(p == 0)
    def _accumulate_bn2_stats():
        sum2_scr[...] += jnp.sum(h2, axis=0, keepdims=True)
        ssq2_scr[...] += jnp.sum(h2 * h2, axis=0, keepdims=True)

    @pl.when(p == 1)
    def _apply_and_store():
        inv_b = 1.0 / float(n_valid * n_valid)
        mean2 = sum2_scr[...] * inv_b
        var2 = jnp.maximum(ssq2_scr[...] * inv_b - mean2 * mean2, 0.0)
        scale2 = g2_ref[...] * jax.lax.rsqrt(var2 + _EPS)
        shift2 = b2_ref[...] - mean2 * scale2
        h3 = jnp.maximum(h2 * scale2 + shift2, 0.0).astype(jnp.bfloat16)
        out = jnp.dot(h3, w3_ref[...],
                      preferred_element_type=jnp.float32) + b3_ref[...]
        o_ref[...] = out.astype(o_ref.dtype)


def _pair_kernel(x_ref, w1_ref, g1_ref, b1_ref, w2_ref, g2_ref, b2_ref,
                 w3_ref, b3_ref, o_ref):
    """Explicit-reference path: single VMEM-resident block.
    TODO(synk): for very large batches this path could reuse the two-pass
    gridded structure of the all-pairs kernel."""
    h = jnp.dot(x_ref[...].astype(jnp.bfloat16), w1_ref[...],
                preferred_element_type=jnp.float32)
    inv_b = 1.0 / h.shape[0]
    h = _bn_relu(h, g1_ref[...], b1_ref[...], inv_b)
    h = jnp.dot(h.astype(jnp.bfloat16), w2_ref[...],
                preferred_element_type=jnp.float32)
    h = _bn_relu(h, g2_ref[...], b2_ref[...], inv_b)
    out = jnp.dot(h.astype(jnp.bfloat16), w3_ref[...],
                  preferred_element_type=jnp.float32) + b3_ref[...]
    o_ref[...] = out.astype(o_ref.dtype)


# ----------------------------------------------------------------------------
# Wrapper
# ----------------------------------------------------------------------------
def comparator_forward(packed, hdim, n_cls, embs, ref_embs=None):
    (w1t, w1b, w1r, g1, b1, w2, g2, b2, w3, b3) = packed
    dp = w2.shape[0]
    cp = w3.shape[1]
    n = embs.shape[0]
    vmem_lim = _vmem_limit_bytes()

    # ---------------- explicit-reference path --------------------------------
    if ref_embs is not None:
        x = jnp.concatenate([embs, ref_embs], axis=-1)
        inputs = (x, w1t, g1, b1, w2, g2, b2, w3, b3)
        vmem = pl.BlockSpec(memory_space=pltpu.MemorySpace.VMEM)
        flops = (2 * n * (2 * hdim) * dp + 2 * n * dp * dp + 2 * n * dp * cp
                 + 16 * n * dp)
        bytes_accessed = int(
            sum(int(a.size) * a.dtype.itemsize for a in inputs) + n * cp * 2)
        out = pl.pallas_call(
            _pair_kernel,
            out_shape=jax.ShapeDtypeStruct((n, cp), jnp.bfloat16),
            in_specs=[vmem] * len(inputs),
            out_specs=vmem,
            compiler_params=pltpu.CompilerParams(vmem_limit_bytes=vmem_lim),
            cost_estimate=pl.CostEstimate(flops=int(flops),
                                          transcendentals=int(2 * dp),
                                          bytes_accessed=bytes_accessed),
        )(*inputs)
        return out[:, :n_cls].astype(jnp.float32)

    # ---------------- all-pairs path ------------------------------------------
    np_pad = _round_up(n, _SUBLANE)
    embs_p = embs if np_pad == n else jnp.pad(embs, ((0, np_pad - n), (0, 0)))
    ti = _pick_row_tile(np_pad)
    num_tiles = np_pad // ti
    rows_blk = ti * np_pad
    b_pad = np_pad * np_pad

    def full(shape):
        return pl.BlockSpec(shape, lambda p, t: (0,) * len(shape))

    in_specs = [
        full(embs_p.shape),
        full(w1b.shape), full(w1r.shape),
        full(g1.shape), full(b1.shape),
        full(w2.shape),
        full(g2.shape), full(b2.shape),
        full(w3.shape), full(b3.shape),
    ]
    # Pass 0 never writes the output; route its (unwritten) buffer flushes to a
    # spare junk block (index num_tiles) so every real output block is written
    # exactly once, in pass 1.
    out_specs = pl.BlockSpec(
        (rows_blk, cp), lambda p, t: (t * p + num_tiles * (1 - p), 0))
    scratch_shapes = [
        pltpu.VMEM((np_pad, dp), jnp.float32),   # a  = embs @ W1_base
        pltpu.VMEM((np_pad, dp), jnp.float32),   # r  = embs @ W1_ref
        pltpu.VMEM((1, dp), jnp.float32),        # BN1 scale
        pltpu.VMEM((1, dp), jnp.float32),        # BN1 shift
        pltpu.VMEM((1, dp), jnp.float32),        # sum(h2)
        pltpu.VMEM((1, dp), jnp.float32),        # sum(h2^2)
    ]
    flops = (2 * 2 * np_pad * hdim * dp          # fc1 halves (once)
             + 2 * 2 * b_pad * dp * dp           # fc2 (recomputed in pass 1)
             + 2 * b_pad * dp * cp               # fc3
             + 20 * b_pad * dp)                  # BN / ReLU / expansion
    bytes_accessed = int(
        sum(int(a.size) * a.dtype.itemsize
            for a in (embs_p, w1b, w1r, g1, b1, w2, g2, b2, w3, b3))
        + (b_pad + rows_blk) * cp * 2)

    grid_spec = pltpu.PrefetchScalarGridSpec(
        num_scalar_prefetch=0,
        grid=(2, num_tiles),
        in_specs=in_specs,
        out_specs=out_specs,
        scratch_shapes=scratch_shapes,
    )
    out = pl.pallas_call(
        functools.partial(_pairs_kernel, n_valid=n),
        out_shape=jax.ShapeDtypeStruct(((num_tiles + 1) * rows_blk, cp),
                                       jnp.bfloat16),
        grid_spec=grid_spec,
        compiler_params=pltpu.CompilerParams(
            dimension_semantics=("arbitrary", "arbitrary"),
            vmem_limit_bytes=vmem_lim),
        cost_estimate=pl.CostEstimate(flops=int(flops),
                                      transcendentals=int(2 * dp),
                                      bytes_accessed=bytes_accessed),
    )(embs_p, w1b, w1r, g1, b1, w2, g2, b2, w3, b3)

    out = out[:b_pad]
    if np_pad != n:
        out = out.reshape(np_pad, np_pad, cp)[:n, :n].reshape(n * n, cp)
    return out[:, :n_cls].astype(jnp.float32)


# ----------------------------------------------------------------------------
# Parameters
# ----------------------------------------------------------------------------
def init_params(hdim, n_cls, key):
    """Deterministic synthetic parameters in torch layout (weight = (out,in))."""
    d = 2 * hdim
    ks = jax.random.split(key, 8)
    w1 = jax.random.normal(ks[0], (d, d), jnp.float32) / jnp.sqrt(d)
    w2 = jax.random.normal(ks[1], (d, d), jnp.float32) / jnp.sqrt(d)
    w3 = jax.random.normal(ks[2], (n_cls, d), jnp.float32) / jnp.sqrt(d)
    b3 = 0.01 * jax.random.normal(ks[3], (n_cls,), jnp.float32)
    g1 = 1.0 + 0.1 * jax.random.normal(ks[4], (d,), jnp.float32)
    b1 = 0.1 * jax.random.normal(ks[5], (d,), jnp.float32)
    g2 = 1.0 + 0.1 * jax.random.normal(ks[6], (d,), jnp.float32)
    b2 = 0.1 * jax.random.normal(ks[7], (d,), jnp.float32)
    return (w1, g1, b1, w2, g2, b2, w3, b3)


def pack_params(params, hdim, n_cls):
    """Transpose, zero-pad to 128 lanes, split fc1, cast matmul weights to bf16."""
    (w1, g1, b1, w2, g2, b2, w3, b3) = params
    d = 2 * hdim
    dp = _round_up(d, _LANE)
    cp = _round_up(n_cls, _LANE)

    def pad2(m, rows, cols):
        z = jnp.zeros((rows, cols), jnp.float32)
        return z.at[:m.shape[0], :m.shape[1]].set(m)

    w1t_f = pad2(w1.T, d, dp)                      # (2h, Dp), x @ W layout
    w1t = w1t_f.astype(jnp.bfloat16)               # unsplit (pair path)
    w1b = w1t_f[:hdim].astype(jnp.bfloat16)        # base half (all-pairs path)
    w1r = w1t_f[hdim:].astype(jnp.bfloat16)        # ref half
    w2t = pad2(w2.T, dp, dp).astype(jnp.bfloat16)
    w3t = pad2(w3.T, dp, cp).astype(jnp.bfloat16)
    g1p = pad2(g1[None, :], 1, dp)                 # padded lanes = 0
    b1p = pad2(b1[None, :], 1, dp)
    g2p = pad2(g2[None, :], 1, dp)
    b2p = pad2(b2[None, :], 1, dp)
    b3p = pad2(b3[None, :], 1, cp)
    return (w1t, w1b, w1r, g1p, b1p, w2t, g2p, b2p, w3t, b3p)


# ----------------------------------------------------------------------------
# References for correctness checks
# ----------------------------------------------------------------------------
def reference_forward_f32(params, hdim, embs, ref_embs=None):
    """Pure-f32 JAX reference with exact torch-module semantics."""
    (w1, g1, b1, w2, g2, b2, w3, b3) = params
    if ref_embs is not None:
        x = jnp.concatenate([embs, ref_embs], axis=-1)
    else:
        n = embs.shape[0]
        base = jnp.broadcast_to(embs[:, None, :], (n, n, hdim)).reshape(-1, hdim)
        ref = jnp.broadcast_to(embs[None, :, :], (n, n, hdim)).reshape(-1, hdim)
        x = jnp.concatenate([base, ref], axis=-1)

    def bn_relu(h, g, b):
        m = jnp.mean(h, axis=0, keepdims=True)
        v = jnp.mean((h - m) ** 2, axis=0, keepdims=True)      # biased var
        return jnp.maximum((h - m) / jnp.sqrt(v + _EPS) * g + b, 0.0)

    h = bn_relu(x @ w1.T, g1, b1)
    h = bn_relu(h @ w2.T, g2, b2)
    return h @ w3.T + b3


def reference_kernel_math(packed, n_cls, embs, ref_embs=None):
    """Pure-JAX mirror of the kernel math (bf16 operands, analytic BN1, bf16 out)."""
    (w1t, w1b, w1r, g1, b1, w2, g2, b2, w3, b3) = packed
    if ref_embs is None:
        eb = embs.astype(jnp.bfloat16)
        a = jnp.dot(eb, w1b, preferred_element_type=jnp.float32)
        r = jnp.dot(eb, w1r, preferred_element_type=jnp.float32)
        n = embs.shape[0]
        inv_n = 1.0 / n
        am = jnp.sum(a, 0, keepdims=True) * inv_n
        rm = jnp.sum(r, 0, keepdims=True) * inv_n
        av = jnp.sum(a * a, 0, keepdims=True) * inv_n - am * am
        rv = jnp.sum(r * r, 0, keepdims=True) * inv_n - rm * rm
        scale1 = g1 * jax.lax.rsqrt(jnp.maximum(av + rv, 0.0) + _EPS)
        shift1 = b1 - (am + rm) * scale1
        h1 = (a[:, None, :] + r[None, :, :]).reshape(n * n, a.shape[1])
        h1 = jnp.maximum(h1 * scale1 + shift1, 0.0)
        batch = n * n
    else:
        x = jnp.concatenate([embs, ref_embs], axis=-1).astype(jnp.bfloat16)
        h1 = jnp.dot(x, w1t, preferred_element_type=jnp.float32)
        batch = h1.shape[0]
        h1 = _bn_relu(h1, g1, b1, 1.0 / batch)
    h2 = jnp.dot(h1.astype(jnp.bfloat16), w2, preferred_element_type=jnp.float32)
    h3 = _bn_relu(h2, g2, b2, 1.0 / batch)
    out = jnp.dot(h3.astype(jnp.bfloat16), w3,
                  preferred_element_type=jnp.float32) + b3
    return out[:, :n_cls].astype(jnp.bfloat16).astype(jnp.float32)


# ----------------------------------------------------------------------------
if __name__ == "__main__":
    hdim = 32
    n_cls = 3
    n_embs = 8

    key = jax.random.PRNGKey(0)
    kp, ke, kr, ko = jax.random.split(key, 4)
    params = init_params(hdim, n_cls, kp)
    packed = pack_params(params, hdim, n_cls)

    embs = jax.random.normal(ke, (n_embs, hdim), jnp.float32)
    ref_embs = jax.random.normal(kr, (n_embs, hdim), jnp.float32)

    fwd_pairs = jax.jit(lambda e: comparator_forward(packed, hdim, n_cls, e))
    fwd_pair = jax.jit(lambda e, r: comparator_forward(packed, hdim, n_cls, e, r))

    # Path 1: all-pairs comparison (ref_embs=None) -> (n_embs*n_embs, n_cls)
    out_pairs = jax.block_until_ready(fwd_pairs(embs))
    # Path 2: explicit reference embeddings -> (n_embs, n_cls)
    out_pair = jax.block_until_ready(fwd_pair(embs, ref_embs))

    assert out_pairs.shape == (n_embs * n_embs, n_cls), out_pairs.shape
    assert out_pair.shape == (n_embs, n_cls), out_pair.shape

    # Tight check vs a pure-JAX mirror of the kernel math (bf16 MXU operands,
    # analytic BN1, two-pass/fused BN stats, bf16 output).
    mir_pairs = reference_kernel_math(packed, n_cls, embs)
    mir_pair = reference_kernel_math(packed, n_cls, embs, ref_embs)
    assert jnp.allclose(out_pairs, mir_pairs, atol=2e-2, rtol=2e-2)
    assert jnp.allclose(out_pair, mir_pair, atol=2e-2, rtol=2e-2)

    # Loose check vs the full-f32 torch-semantics reference.
    ref_pairs = reference_forward_f32(params, hdim, embs)
    ref_pair = reference_forward_f32(params, hdim, embs, ref_embs)
    assert jnp.allclose(out_pairs, ref_pairs, atol=1e-1, rtol=1e-1)
    assert jnp.allclose(out_pair, ref_pair, atol=1e-1, rtol=1e-1)

    # Also exercise the padded / masked all-pairs path (N not a multiple of 8).
    embs_odd = jax.random.normal(ko, (10, hdim), jnp.float32)
    out_odd = jax.block_until_ready(
        jax.jit(lambda e: comparator_forward(packed, hdim, n_cls, e))(embs_odd))
    assert out_odd.shape == (100, n_cls), out_odd.shape
    mir_odd = reference_kernel_math(packed, n_cls, embs_odd)
    ref_odd = reference_forward_f32(params, hdim, embs_odd)
    assert jnp.allclose(out_odd, mir_odd, atol=2e-2, rtol=2e-2)
    assert jnp.allclose(out_odd, ref_odd, atol=1e-1, rtol=1e-1)

    print("KERNEL_OK")
</pallas_src>

<mosaic_0001>
module attributes {stable_mosaic.version = 11 : i64} {
  func.func @_pairs_kernel(%arg0: i32, %arg1: i32, %arg2: memref<8x32xf32, #tpu.memory_space<vmem>>, %arg3: memref<32x128xbf16, #tpu.memory_space<vmem>>, %arg4: memref<32x128xbf16, #tpu.memory_space<vmem>>, %arg5: memref<1x128xf32, #tpu.memory_space<vmem>>, %arg6: memref<1x128xf32, #tpu.memory_space<vmem>>, %arg7: memref<128x128xbf16, #tpu.memory_space<vmem>>, %arg8: memref<1x128xf32, #tpu.memory_space<vmem>>, %arg9: memref<1x128xf32, #tpu.memory_space<vmem>>, %arg10: memref<128x128xbf16, #tpu.memory_space<vmem>>, %arg11: memref<1x128xf32, #tpu.memory_space<vmem>>, %arg12: memref<64x128xbf16, #tpu.memory_space<vmem>>, %arg13: memref<8x128xf32, #tpu.memory_space<vmem>>, %arg14: memref<8x128xf32, #tpu.memory_space<vmem>>, %arg15: memref<1x128xf32, #tpu.memory_space<vmem>>, %arg16: memref<1x128xf32, #tpu.memory_space<vmem>>, %arg17: memref<1x128xf32, #tpu.memory_space<vmem>>, %arg18: memref<1x128xf32, #tpu.memory_space<vmem>>) attributes {dimension_semantics = [#tpu.dimension_semantics<arbitrary>, #tpu.dimension_semantics<arbitrary>], iteration_bounds = array<i64: 2, 1>, scalar_prefetch = 0 : i64, scratch_operands = 6 : i64, tpu.core_type = #tpu.core_type<tc>, window_params = [{pipeline_mode = #tpu.pipeline_mode<synchronous>, transform_indices = @transform_0, window_bounds = array<i64: 8, 32>}, {pipeline_mode = #tpu.pipeline_mode<synchronous>, transform_indices = @transform_1, window_bounds = array<i64: 32, 128>}, {pipeline_mode = #tpu.pipeline_mode<synchronous>, transform_indices = @transform_2, window_bounds = array<i64: 32, 128>}, {pipeline_mode = #tpu.pipeline_mode<synchronous>, transform_indices = @transform_3, window_bounds = array<i64: 1, 128>}, {pipeline_mode = #tpu.pipeline_mode<synchronous>, transform_indices = @transform_4, window_bounds = array<i64: 1, 128>}, {pipeline_mode = #tpu.pipeline_mode<synchronous>, transform_indices = @transform_5, window_bounds = array<i64: 128, 128>}, {pipeline_mode = #tpu.pipeline_mode<synchronous>, transform_indices = @transform_6, window_bounds = array<i64: 1, 128>}, {pipeline_mode = #tpu.pipeline_mode<synchronous>, transform_indices = @transform_7, window_bounds = array<i64: 1, 128>}, {pipeline_mode = #tpu.pipeline_mode<synchronous>, transform_indices = @transform_8, window_bounds = array<i64: 128, 128>}, {pipeline_mode = #tpu.pipeline_mode<synchronous>, transform_indices = @transform_9, window_bounds = array<i64: 1, 128>}, {transform_indices = @transform_10, window_bounds = array<i64: 64, 128>}]} {
    %c0_i32 = arith.constant 0 : i32
    %0 = arith.cmpi eq, %arg0, %c0_i32 : i32
    %c0_i32_0 = arith.constant 0 : i32
    %1 = arith.cmpi eq, %arg1, %c0_i32_0 : i32
    %2 = arith.andi %0, %1 : i1
    %3 = arith.extui %2 : i1 to i32
    %c0_i32_1 = arith.constant 0 : i32
    %4 = arith.cmpi ne, %3, %c0_i32_1 : i32
    scf.if %4 {
      %c0_14 = arith.constant 0 : index
      %c0_15 = arith.constant 0 : index
      %35 = vector.load %arg2[%c0_14, %c0_15] : memref<8x32xf32, #tpu.memory_space<vmem>>, vector<8x32xf32>
      %36 = arith.truncf %35 : vector<8x32xf32> to vector<8x32xbf16>
      %c0_16 = arith.constant 0 : index
      %c0_17 = arith.constant 0 : index
      %37 = vector.load %arg3[%c0_16, %c0_17] : memref<32x128xbf16, #tpu.memory_space<vmem>>, vector<32x128xbf16>
      %cst_18 = arith.constant dense<0.000000e+00> : vector<8x128xf32>
      %38 = tpu.matmul %36, %37, %cst_18 {dimension_numbers = #tpu.dot_dimension_numbers<[1], [0], [0], [1], [0, 0, 1, 1], [], []>} : vector<8x32xbf16>, vector<32x128xbf16>, vector<8x128xf32> -> vector<8x128xf32>
      %c0_19 = arith.constant 0 : index
      %c0_20 = arith.constant 0 : index
      %39 = vector.load %arg4[%c0_19, %c0_20] : memref<32x128xbf16, #tpu.memory_space<vmem>>, vector<32x128xbf16>
      %cst_21 = arith.constant dense<0.000000e+00> : vector<8x128xf32>
      %40 = tpu.matmul %36, %39, %cst_21 {dimension_numbers = #tpu.dot_dimension_numbers<[1], [0], [0], [1], [0, 0, 1, 1], [], []>} : vector<8x32xbf16>, vector<32x128xbf16>, vector<8x128xf32> -> vector<8x128xf32>
      %c0_22 = arith.constant 0 : index
      %c0_23 = arith.constant 0 : index
      %41 = vector.load %arg13[%c0_22, %c0_23] : memref<8x128xf32, #tpu.memory_space<vmem>>, vector<8x128xf32>
      tpu.vector_store %arg13[%c0_22, %c0_23], %38 {strides = array<i32>} : memref<8x128xf32, #tpu.memory_space<vmem>>, vector<8x128xf32>,
      %c0_24 = arith.constant 0 : index
      %c0_25 = arith.constant 0 : index
      %42 = vector.load %arg14[%c0_24, %c0_25] : memref<8x128xf32, #tpu.memory_space<vmem>>, vector<8x128xf32>
      tpu.vector_store %arg14[%c0_24, %c0_25], %40 {strides = array<i32>} : memref<8x128xf32, #tpu.memory_space<vmem>>, vector<8x128xf32>,
      %cst_26 = arith.constant dense<0.000000e+00> : vector<128xf32>
      %43 = vector.multi_reduction <add>, %38, %cst_26 [0] : vector<8x128xf32> to vector<128xf32>
      %44 = vector.shape_cast %43 : vector<128xf32> to vector<1x128xf32>
      %cst_27 = arith.constant 1.250000e-01 : f32
      %45 = vector.broadcast %cst_27 : f32 to vector<1x128xf32>
      %46 = arith.mulf %44, %45 : vector<1x128xf32>
      %cst_28 = arith.constant dense<0.000000e+00> : vector<128xf32>
      %47 = vector.multi_reduction <add>, %40, %cst_28 [0] : vector<8x128xf32> to vector<128xf32>
      %48 = vector.shape_cast %47 : vector<128xf32> to vector<1x128xf32>
      %cst_29 = arith.constant 1.250000e-01 : f32
      %49 = vector.broadcast %cst_29 : f32 to vector<1x128xf32>
      %50 = arith.mulf %48, %49 : vector<1x128xf32>
      %51 = arith.mulf %38, %38 : vector<8x128xf32>
      %cst_30 = arith.constant dense<0.000000e+00> : vector<128xf32>
      %52 = vector.multi_reduction <add>, %51, %cst_30 [0] : vector<8x128xf32> to vector<128xf32>
      %53 = vector.shape_cast %52 : vector<128xf32> to vector<1x128xf32>
      %cst_31 = arith.constant 1.250000e-01 : f32
      %54 = vector.broadcast %cst_31 : f32 to vector<1x128xf32>
      %55 = arith.mulf %53, %54 : vector<1x128xf32>
      %56 = arith.mulf %46, %46 : vector<1x128xf32>
      %57 = arith.subf %55, %56 : vector<1x128xf32>
      %58 = arith.mulf %40, %40 : vector<8x128xf32>
      %cst_32 = arith.constant dense<0.000000e+00> : vector<128xf32>
      %59 = vector.multi_reduction <add>, %58, %cst_32 [0] : vector<8x128xf32> to vector<128xf32>
      %60 = vector.shape_cast %59 : vector<128xf32> to vector<1x128xf32>
      %cst_33 = arith.constant 1.250000e-01 : f32
      %61 = vector.broadcast %cst_33 : f32 to vector<1x128xf32>
      %62 = arith.mulf %60, %61 : vector<1x128xf32>
      %63 = arith.mulf %50, %50 : vector<1x128xf32>
      %64 = arith.subf %62, %63 : vector<1x128xf32>
      %c0_34 = arith.constant 0 : index
      %c0_35 = arith.constant 0 : index
      %65 = vector.load %arg5[%c0_34, %c0_35] : memref<1x128xf32, #tpu.memory_space<vmem>>, vector<1x128xf32>
      %66 = arith.addf %57, %64 : vector<1x128xf32>
      %cst_36 = arith.constant 0.000000e+00 : f32
      %67 = vector.broadcast %cst_36 : f32 to vector<1x128xf32>
      %68 = arith.maximumf %66, %67 : vector<1x128xf32>
      %cst_37 = arith.constant 9.99999974E-6 : f32
      %69 = vector.broadcast %cst_37 : f32 to vector<1x128xf32>
      %70 = arith.addf %68, %69 : vector<1x128xf32>
      %71 = math.rsqrt %70 : vector<1x128xf32>
      %72 = arith.mulf %65, %71 : vector<1x128xf32>
      %c0_38 = arith.constant 0 : index
      %c0_39 = arith.constant 0 : index
      %73 = vector.load %arg15[%c0_38, %c0_39] : memref<1x128xf32, #tpu.memory_space<vmem>>, vector<1x128xf32>
      tpu.vector_store %arg15[%c0_38, %c0_39], %72 {strides = array<i32>} : memref<1x128xf32, #tpu.memory_space<vmem>>, vector<1x128xf32>,
      %c0_40 = arith.constant 0 : index
      %c0_41 = arith.constant 0 : index
      %74 = vector.load %arg6[%c0_40, %c0_41] : memref<1x128xf32, #tpu.memory_space<vmem>>, vector<1x128xf32>
      %75 = arith.addf %46, %50 : vector<1x128xf32>
      %76 = arith.mulf %75, %72 : vector<1x128xf32>
      %77 = arith.subf %74, %76 : vector<1x128xf32>
      %c0_42 = arith.constant 0 : index
      %c0_43 = arith.constant 0 : index
      %78 = vector.load %arg16[%c0_42, %c0_43] : memref<1x128xf32, #tpu.memory_space<vmem>>, vector<1x128xf32>
      tpu.vector_store %arg16[%c0_42, %c0_43], %77 {strides = array<i32>} : memref<1x128xf32, #tpu.memory_space<vmem>>, vector<1x128xf32>,
      %cst_44 = arith.constant 0.000000e+00 : f32
      %79 = vector.broadcast %cst_44 : f32 to vector<1x128xf32>
      %c0_45 = arith.constant 0 : index
      %c0_46 = arith.constant 0 : index
      %80 = vector.load %arg17[%c0_45, %c0_46] : memref<1x128xf32, #tpu.memory_space<vmem>>, vector<1x128xf32>
      tpu.vector_store %arg17[%c0_45, %c0_46], %79 {strides = array<i32>} : memref<1x128xf32, #tpu.memory_space<vmem>>, vector<1x128xf32>,
      %cst_47 = arith.constant 0.000000e+00 : f32
      %81 = vector.broadcast %cst_47 : f32 to vector<1x128xf32>
      %c0_48 = arith.constant 0 : index
      %c0_49 = arith.constant 0 : index
      %82 = vector.load %arg18[%c0_48, %c0_49] : memref<1x128xf32, #tpu.memory_space<vmem>>, vector<1x128xf32>
      tpu.vector_store %arg18[%c0_48, %c0_49], %81 {strides = array<i32>} : memref<1x128xf32, #tpu.memory_space<vmem>>, vector<1x128xf32>,
    } else {
    }
    %c8_i32 = arith.constant 8 : i32
    %5 = arith.muli %arg1, %c8_i32 : i32
    %6 = tpu.assume_multiple %5, 8 : i32
    %7 = arith.index_cast %6 : i32 to index
    %c0 = arith.constant 0 : index
    %8 = vector.load %arg13[%7, %c0] : memref<8x128xf32, #tpu.memory_space<vmem>>, vector<8x128xf32>
    %9 = vector.shape_cast %8 : vector<8x128xf32> to vector<8x1x128xf32>
    %c0_2 = arith.constant 0 : index
    %c0_3 = arith.constant 0 : index
    %10 = vector.load %arg14[%c0_2, %c0_3] : memref<8x128xf32, #tpu.memory_space<vmem>>, vector<8x128xf32>
    %11 = vector.shape_cast %10 : vector<8x128xf32> to vector<1x8x128xf32>
    %12 = vector.broadcast %9 : vector<8x1x128xf32> to vector<8x8x128xf32>
    %13 = vector.broadcast %11 : vector<1x8x128xf32> to vector<8x8x128xf32>
    %14 = arith.addf %12, %13 : vector<8x8x128xf32>
    %c0_4 = arith.constant 0 : index
    %c0_5 = arith.constant 0 : index
    %15 = vector.load %arg15[%c0_4, %c0_5] : memref<1x128xf32, #tpu.memory_space<vmem>>, vector<1x128xf32>
    %16 = vector.shape_cast %15 : vector<1x128xf32> to vector<1x1x128xf32>
    %17 = vector.broadcast %16 : vector<1x1x128xf32> to vector<8x8x128xf32>
    %18 = arith.mulf %14, %17 : vector<8x8x128xf32>
    %c0_6 = arith.constant 0 : index
    %c0_7 = arith.constant 0 : index
    %19 = vector.load %arg16[%c0_6, %c0_7] : memref<1x128xf32, #tpu.memory_space<vmem>>, vector<1x128xf32>
    %20 = vector.shape_cast %19 : vector<1x128xf32> to vector<1x1x128xf32>
    %21 = vector.broadcast %20 : vector<1x1x128xf32> to vector<8x8x128xf32>
    %22 = arith.addf %18, %21 : vector<8x8x128xf32>
    %cst = arith.constant 0.000000e+00 : f32
    %23 = vector.broadcast %cst : f32 to vector<8x8x128xf32>
    %24 = arith.maximumf %22, %23 : vector<8x8x128xf32>
    %25 = vector.shape_cast %24 : vector<8x8x128xf32> to vector<64x128xf32>
    %26 = arith.truncf %25 : vector<64x128xf32> to vector<64x128xbf16>
    %c0_8 = arith.constant 0 : index
    %c0_9 = arith.constant 0 : index
    %27 = vector.load %arg7[%c0_8, %c0_9] : memref<128x128xbf16, #tpu.memory_space<vmem>>, vector<128x128xbf16>
    %cst_10 = arith.constant dense<0.000000e+00> : vector<64x128xf32>
    %28 = tpu.matmul %26, %27, %cst_10 {dimension_numbers = #tpu.dot_dimension_numbers<[1], [0], [0], [1], [0, 0, 1, 1], [], []>} : vector<64x128xbf16>, vector<128x128xbf16>, vector<64x128xf32> -> vector<64x128xf32>
    %c0_i32_11 = arith.constant 0 : i32
    %29 = arith.cmpi eq, %arg0, %c0_i32_11 : i32
    %30 = arith.extui %29 : i1 to i32
    %c0_i32_12 = arith.constant 0 : i32
    %31 = arith.cmpi ne, %30, %c0_i32_12 : i32
    scf.if %31 {
      %c0_14 = arith.constant 0 : index
      %c0_15 = arith.constant 0 : index
      %35 = vector.load %arg17[%c0_14, %c0_15] : memref<1x128xf32, #tpu.memory_space<vmem>>, vector<1x128xf32>
      %cst_16 = arith.constant dense<0.000000e+00> : vector<128xf32>
      %36 = vector.multi_reduction <add>, %28, %cst_16 [0] : vector<64x128xf32> to vector<128xf32>
      %37 = vector.shape_cast %36 : vector<128xf32> to vector<1x128xf32>
      %38 = arith.addf %35, %37 : vector<1x128xf32>
      %c0_17 = arith.constant 0 : index
      %c0_18 = arith.constant 0 : index
      %39 = vector.load %arg17[%c0_17, %c0_18] : memref<1x128xf32, #tpu.memory_space<vmem>>, vector<1x128xf32>
      tpu.vector_store %arg17[%c0_17, %c0_18], %38 {strides = array<i32>} : memref<1x128xf32, #tpu.memory_space<vmem>>, vector<1x128xf32>,
      %c0_19 = arith.constant 0 : index
      %c0_20 = arith.constant 0 : index
      %40 = vector.load %arg18[%c0_19, %c0_20] : memref<1x128xf32, #tpu.memory_space<vmem>>, vector<1x128xf32>
      %41 = arith.mulf %28, %28 : vector<64x128xf32>
      %cst_21 = arith.constant dense<0.000000e+00> : vector<128xf32>
      %42 = vector.multi_reduction <add>, %41, %cst_21 [0] : vector<64x128xf32> to vector<128xf32>
      %43 = vector.shape_cast %42 : vector<128xf32> to vector<1x128xf32>
      %44 = arith.addf %40, %43 : vector<1x128xf32>
      %c0_22 = arith.constant 0 : index
      %c0_23 = arith.constant 0 : index
      %45 = vector.load %arg18[%c0_22, %c0_23] : memref<1x128xf32, #tpu.memory_space<vmem>>, vector<1x128xf32>
      tpu.vector_store %arg18[%c0_22, %c0_23], %44 {strides = array<i32>} : memref<1x128xf32, #tpu.memory_space<vmem>>, vector<1x128xf32>,
    } else {
    }
    %c1_i32 = arith.constant 1 : i32
    %32 = arith.cmpi eq, %arg0, %c1_i32 : i32
    %33 = arith.extui %32 : i1 to i32
    %c0_i32_13 = arith.constant 0 : i32
    %34 = arith.cmpi ne, %33, %c0_i32_13 : i32
    scf.if %34 {
      %c0_14 = arith.constant 0 : index
      %c0_15 = arith.constant 0 : index
      %35 = vector.load %arg17[%c0_14, %c0_15] : memref<1x128xf32, #tpu.memory_space<vmem>>, vector<1x128xf32>
      %cst_16 = arith.constant 1.562500e-02 : f32
      %36 = vector.broadcast %cst_16 : f32 to vector<1x128xf32>
      %37 = arith.mulf %35, %36 : vector<1x128xf32>
      %c0_17 = arith.constant 0 : index
      %c0_18 = arith.constant 0 : index
      %38 = vector.load %arg18[%c0_17, %c0_18] : memref<1x128xf32, #tpu.memory_space<vmem>>, vector<1x128xf32>
      %cst_19 = arith.constant 1.562500e-02 : f32
      %39 = vector.broadcast %cst_19 : f32 to vector<1x128xf32>
      %40 = arith.mulf %38, %39 : vector<1x128xf32>
      %41 = arith.mulf %37, %37 : vector<1x128xf32>
      %42 = arith.subf %40, %41 : vector<1x128xf32>
      %cst_20 = arith.constant 0.000000e+00 : f32
      %43 = vector.broadcast %cst_20 : f32 to vector<1x128xf32>
      %44 = arith.maximumf %42, %43 : vector<1x128xf32>
      %c0_21 = arith.constant 0 : index
      %c0_22 = arith.constant 0 : index
      %45 = vector.load %arg8[%c0_21, %c0_22] : memref<1x128xf32, #tpu.memory_space<vmem>>, vector<1x128xf32>
      %cst_23 = arith.constant 9.99999974E-6 : f32
      %46 = vector.broadcast %cst_23 : f32 to vector<1x128xf32>
      %47 = arith.addf %44, %46 : vector<1x128xf32>
      %48 = math.rsqrt %47 : vector<1x128xf32>
      %49 = arith.mulf %45, %48 : vector<1x128xf32>
      %c0_24 = arith.constant 0 : index
      %c0_25 = arith.constant 0 : index
      %50 = vector.load %arg9[%c0_24, %c0_25] : memref<1x128xf32, #tpu.memory_space<vmem>>, vector<1x128xf32>
      %51 = arith.mulf %37, %49 : vector<1x128xf32>
      %52 = arith.subf %50, %51 : vector<1x128xf32>
      %53 = vector.broadcast %49 : vector<1x128xf32> to vector<64x128xf32>
      %54 = arith.mulf %28, %53 : vector<64x128xf32>
      %55 = vector.broadcast %52 : vector<1x128xf32> to vector<64x128xf32>
      %56 = arith.addf %54, %55 : vector<64x128xf32>
      %cst_26 = arith.constant 0.000000e+00 : f32
      %57 = vector.broadcast %cst_26 : f32 to vector<64x128xf32>
      %58 = arith.maximumf %56, %57 : vector<64x128xf32>
      %59 = arith.truncf %58 : vector<64x128xf32> to vector<64x128xbf16>
      %c0_27 = arith.constant 0 : index
      %c0_28 = arith.constant 0 : index
      %60 = vector.load %arg10[%c0_27, %c0_28] : memref<128x128xbf16, #tpu.memory_space<vmem>>, vector<128x128xbf16>
      %cst_29 = arith.constant dense<0.000000e+00> : vector<64x128xf32>
      %61 = tpu.matmul %59, %60, %cst_29 {dimension_numbers = #tpu.dot_dimension_numbers<[1], [0], [0], [1], [0, 0, 1, 1], [], []>} : vector<64x128xbf16>, vector<128x128xbf16>, vector<64x128xf32> -> vector<64x128xf32>
      %c0_30 = arith.constant 0 : index
      %c0_31 = arith.constant 0 : index
      %62 = vector.load %arg11[%c0_30, %c0_31] : memref<1x128xf32, #tpu.memory_space<vmem>>, vector<1x128xf32>
      %63 = vector.broadcast %62 : vector<1x128xf32> to vector<64x128xf32>
      %64 = arith.addf %61, %63 : vector<64x128xf32>
      %65 = arith.truncf %64 : vector<64x128xf32> to vector<64x128xbf16>
      %c0_32 = arith.constant 0 : index
      %c0_33 = arith.constant 0 : index
      %66 = vector.load %arg12[%c0_32, %c0_33] : memref<64x128xbf16, #tpu.memory_space<vmem>>, vector<64x128xbf16>
      tpu.vector_store %arg12[%c0_32, %c0_33], %65 {strides = array<i32>} : memref<64x128xbf16, #tpu.memory_space<vmem>>, vector<64x128xbf16>,
    } else {
    }
    return
  }
  func.func @transform_0(%arg0: i32, %arg1: i32) -> (i32, i32) {
    %c0_i32 = arith.constant 0 : i32
    %c0_i32_0 = arith.constant 0 : i32
    %c0_i32_1 = arith.constant 0 : i32
    return %c0_i32, %c0_i32_0 : i32, i32
  }
  func.func @transform_1(%arg0: i32, %arg1: i32) -> (i32, i32) {
    %c0_i32 = arith.constant 0 : i32
    %c0_i32_0 = arith.constant 0 : i32
    %c0_i32_1 = arith.constant 0 : i32
    return %c0_i32, %c0_i32_0 : i32, i32
  }
  func.func @transform_2(%arg0: i32, %arg1: i32) -> (i32, i32) {
    %c0_i32 = arith.constant 0 : i32
    %c0_i32_0 = arith.constant 0 : i32
    %c0_i32_1 = arith.constant 0 : i32
    return %c0_i32, %c0_i32_0 : i32, i32
  }
  func.func @transform_3(%arg0: i32, %arg1: i32) -> (i32, i32) {
    %c0_i32 = arith.constant 0 : i32
    %c0_i32_0 = arith.constant 0 : i32
    %c0_i32_1 = arith.constant 0 : i32
    return %c0_i32, %c0_i32_0 : i32, i32
  }
  func.func @transform_4(%arg0: i32, %arg1: i32) -> (i32, i32) {
    %c0_i32 = arith.constant 0 : i32
    %c0_i32_0 = arith.constant 0 : i32
    %c0_i32_1 = arith.constant 0 : i32
    return %c0_i32, %c0_i32_0 : i32, i32
  }
  func.func @transform_5(%arg0: i32, %arg1: i32) -> (i32, i32) {
    %c0_i32 = arith.constant 0 : i32
    %c0_i32_0 = arith.constant 0 : i32
    %c0_i32_1 = arith.constant 0 : i32
    return %c0_i32, %c0_i32_0 : i32, i32
  }
  func.func @transform_6(%arg0: i32, %arg1: i32) -> (i32, i32) {
    %c0_i32 = arith.constant 0 : i32
    %c0_i32_0 = arith.constant 0 : i32
    %c0_i32_1 = arith.constant 0 : i32
    return %c0_i32, %c0_i32_0 : i32, i32
  }
  func.func @transform_7(%arg0: i32, %arg1: i32) -> (i32, i32) {
    %c0_i32 = arith.constant 0 : i32
    %c0_i32_0 = arith.constant 0 : i32
    %c0_i32_1 = arith.constant 0 : i32
    return %c0_i32, %c0_i32_0 : i32, i32
  }
  func.func @transform_8(%arg0: i32, %arg1: i32) -> (i32, i32) {
    %c0_i32 = arith.constant 0 : i32
    %c0_i32_0 = arith.constant 0 : i32
    %c0_i32_1 = arith.constant 0 : i32
    return %c0_i32, %c0_i32_0 : i32, i32
  }
  func.func @transform_9(%arg0: i32, %arg1: i32) -> (i32, i32) {
    %c0_i32 = arith.constant 0 : i32
    %c0_i32_0 = arith.constant 0 : i32
    %c0_i32_1 = arith.constant 0 : i32
    return %c0_i32, %c0_i32_0 : i32, i32
  }
  func.func @transform_10(%arg0: i32, %arg1: i32) -> (i32, i32) {
    %0 = arith.muli %arg1, %arg0 : i32
    %c1_i32 = arith.constant 1 : i32
    %1 = arith.subi %c1_i32, %arg0 : i32
    %c1_i32_0 = arith.constant 1 : i32
    %2 = arith.muli %c1_i32_0, %1 : i32
    %3 = arith.addi %0, %2 : i32
    %c0_i32 = arith.constant 0 : i32
    %c0_i32_1 = arith.constant 0 : i32
    return %3, %c0_i32 : i32, i32
  }
}

</mosaic_0001>

<bundles_post_ra>
// kernel: _lambda_.1
= control target key start
LH: loop header
LB: loop body
LE: loop exit
PB: predicated region body
PF: predicated region fallthrough
CT: control target
= control target key end

     0   :  { %s2186_s0 = inlined_call_operand.hbm [shape: f32[8,32], index: 0, kind: input, shape index: {}]   ;;  %s2187_s1 = inlined_call_operand.vmem [shape: bf16[32,128], index: 1, kind: input, shape index: {}]   ;;  %s2188_s2 = inlined_call_operand.vmem [shape: bf16[32,128], index: 2, kind: input, shape index: {}]   ;;  %s2189_s3 = inlined_call_operand.hbm [shape: f32[1,128], index: 3, kind: input, shape index: {}]   ;;  %s2190_s4 = inlined_call_operand.hbm [shape: f32[1,128], index: 4, kind: input, shape index: {}]   ;;  %s2191_s5 = inlined_call_operand.hbm [shape: bf16[128,128], index: 5, kind: input, shape index: {}]   ;;  %s2192_s6 = inlined_call_operand.hbm [shape: f32[1,128], index: 6, kind: input, shape index: {}]   ;;  %s2193_s7 = inlined_call_operand.vmem [shape: f32[1,128], index: 7, kind: input, shape index: {}]   ;;  %s2194_s8 = inlined_call_operand.hbm [shape: bf16[128,128], index: 8, kind: input, shape index: {}]   ;;  %s2195_s9 = inlined_call_operand.vmem [shape: f32[1,128], index: 9, kind: input, shape index: {}]   ;;  %s2196_s10 = inlined_call_operand.vmem [shape: bf16[128,128], index: 10, kind: output, shape index: {}]  }
   0x1   :  { %2202 = sst [smem:[#allocation23_spill]] %s2189_s3 }
   0x2   :  { %15 = vsyncpa [#allocation9], 0 }
   0x3   :  { %16 = vsyncpa [#allocation11], 0 }
   0x4   :  { %17 = vsyncpa [#allocation14], 0 }
   0x5   :  { %18 = vsyncpa [#allocation17], 0  ;;  %s1900_s13 = smov 0   ;;  %s1902_s14 = smov 0  }
   0x6   :  { %s1904_s15 = smov 0  }
   0x7 LB: > { %2203 = sst [smem:[#allocation22_spill]] %s1832_s15  ;;  %s1834_s16 = smov [#allocation10]   ;;  %s1832_s15 = sphi %s1904_s15, %s24_s15   ;;  %s1828_s14 = sphi %s1902_s14, %s2214_s14   ;;  %s1824_s13 = sphi %s1900_s13, %s2213_s13  }
   0x8   : > { %s313_s17 = sshll.u32 %s1834_s16, 4  ;;  %s1297_s18 = sadd.s32 4294967295, %s1832_s15   ;;  %s314_s17 = int_to_ptr.vmem [resolvable:$true] %s313_s17 }
   0x9   : > { %p1299_p0 = scmp.ge.s32.totalorder %s1832_s15, 1  ;;  %p283_p1 = scmp.lt.s32.totalorder %s1832_s15, 3 }
   0xa   : > { %p1918_p2 = scmp.eq.s32.totalorder %s1297_s18, 0  ;;  %s1835_s21 = smov [#allocation13]  }
   0xb   : > { %p1922_p3 = pnand %p1299_p0, %p283_p1  ;;  %s334_s22 = sshll.u32 %s1835_s21, 4  ;;  %s1928_s22 = int_to_ptr.vmem [resolvable:$true] %s334_s22 }
   0xc   : > { %s2204_s19 = scalar_select %p1918_p2, 1, 0 }
   0xd   : > { %s2205_s20 = scalar_select %p1922_p3, 1, 0 }
   0xe   : > { %p1535_p4 = pneg %p1922_p3  ;;  %s36_s24 = sadd.s32 1, %s1828_s14 }
   0xf   : > { %s2207_s3 = sld [smem:[#allocation23_spill]] }
  0x10   : > { %p1932_p5 = pnand %p1918_p2, %p1535_p4 }
  0x12   : > { %p1945_p7 = pneg %p1932_p5 }
  0x15   : > { %s1626_s27 = scalar_lea.hbm %s2207_s3, 16 }
  0x16   : > { %p1627_p6 = scmp.ne.s32.totalorder %s2207_s3, %s1626_s27  ;;  %p1633_p10 = scmp.lt.u32.totalorder %s1626_s27, %s2207_s3 }
  0x18   : > { %p1629_p8 = pnand %p1945_p7, %p1627_p6 }
  0x1a   : > { %p1630_p9 = pneg %p1629_p8 }
  0x1c   : > { %p1635_p11 = pnand %p1633_p10, %p1630_p9 }
  0x1e   : > { %1638 = shalt.err (!%p1635_p11)
}
  0x1f   : > { %s1639_s16 = scalar_lea.vmem %s314_s17, 16  ;;  %s1646_s18 = scalar_lea.vmem %s314_s17, 32 }
  0x20   : > { %p1640_p12 = scmp.ne.s32.totalorder %s314_s17, %s1639_s16  ;;  %p1647_p1 = scmp.lt.s32.totalorder %s314_s17, %s314_s17 }
  0x21   : > { %p1648_p4 = scmp.lt.s32.totalorder %s1646_s18, %s1639_s16 }
  0x22   : > { %p1642_p13 = pnand %p1640_p12, %p1945_p7 }
  0x23   : > { %p1649_p2 = por %p1648_p4, %p1647_p1 }
  0x24   : > { %p1643_p0 = pneg %p1642_p13 }
  0x26   : > { %p1650_p3 = pnand %p1649_p2, %p1643_p0 }
  0x28   : > { %1653 = shalt.err (!%p1650_p3)
}
  0x29   : > { %1541 = dma.hbm_to_vmem [thread:$0]  (!%p1932_p5), %s2207_s3, 16, %s314_s17, [#allocation11]  }
  0x2a   : > { %s1654_s28 = scalar_lea.hbm %s2191_s5, 1024 }
  0x2b   : > { %p1655_p6 = scmp.ne.s32.totalorder %s2191_s5, %s1654_s28  ;;  %p1661_p2 = scmp.lt.u32.totalorder %s1654_s28, %s2191_s5 }
  0x2d   : > { %p1657_p8 = pnand %p1655_p6, %p1945_p7 }
  0x2f   : > { %p1658_p9 = pneg %p1657_p8 }
  0x31   : > { %p1663_p3 = pnand %p1661_p2, %p1658_p9 }
  0x33   : > { %1666 = shalt.err (!%p1663_p3)
}
  0x34   : > { %s1667_s17 = scalar_lea.vmem %s1928_s22, 1024  ;;  %p1675_p13 = scmp.lt.s32.totalorder %s1928_s22, %s1928_s22 }
  0x35   : > { %p1668_p10 = scmp.ne.s32.totalorder %s1928_s22, %s1667_s17  ;;  %p1676_p0 = scmp.lt.s32.totalorder %s1667_s17, %s1667_s17 }
  0x37   : > { %p1670_p11 = pnand %p1668_p10, %p1945_p7  ;;  %p1677_p1 = por %p1676_p0, %p1675_p13 }
  0x39   : > { %p1671_p12 = pneg %p1670_p11 }
  0x3b   : > { %p1678_p4 = pnand %p1677_p1, %p1671_p12 }
  0x3d   : > { %1681 = shalt.err (!%p1678_p4)
}
  0x3e   : > { %s2201_s18 = smov 64   ;;  %s1837_s21 = smov 4  }
  0x3f   : > { %1547 = dma.hbm_to_vmem [thread:$0]  (!%p1932_p5), %s2191_s5, 1024, %s1928_s22, [#allocation14], %s2201_s18, %s2201_s18, %s1837_s21  }
  0x40   : > { %p38_p6 = scmp.ge.s32.totalorder %s36_s24, 2  ;;  %s1838_s27 = smov [#allocation8]  }
  0x41   : > { %s296_s28 = sshll.u32 %s1838_s27, 4  ;;  %s1839_s29 = smov [#allocation12]   ;;  %s297_s28 = int_to_ptr.vmem [resolvable:$true] %s296_s28 }
  0x42   : > { %s2216_s24 = smov (%p38_p6, %s36_s24), 0  ;;  %s324_s11 = sshll.u32 %s1839_s29, 4  ;;  %s325_s11 = int_to_ptr.vmem [resolvable:$true] %s324_s11 }
  0x43   : > { %s1682_s17 = scalar_lea.hbm %s2186_s0, 128 }
  0x44   : > { %p1683_p8 = scmp.ne.s32.totalorder %s2186_s0, %s1682_s17  ;;  %p1689_p3 = scmp.lt.u32.totalorder %s1682_s17, %s2186_s0 }
  0x46   : > { %p1685_p9 = pnand %p1683_p8, %p1945_p7 }
  0x48   : > { %p1686_p2 = pneg %p1685_p9 }
  0x4a   : > { %p1691_p10 = pnand %p1689_p3, %p1686_p2 }
  0x4c   : > { %1694 = shalt.err (!%p1691_p10)
}
  0x4d   : > { %s1695_s26 = scalar_lea.vmem %s297_s28, 128  ;;  %p1703_p0 = scmp.lt.s32.totalorder %s297_s28, %s297_s28 }
  0x4e   : > { %p1696_p11 = scmp.ne.s32.totalorder %s297_s28, %s1695_s26  ;;  %p1704_p1 = scmp.lt.s32.totalorder %s1695_s26, %s1695_s26 }
  0x50   : > { %p1698_p12 = pnand %p1696_p11, %p1945_p7  ;;  %p1705_p4 = por %p1704_p1, %p1703_p0 }
  0x52   : > { %p1699_p13 = pneg %p1698_p12 }
  0x54   : > { %p1706_p6 = pnand %p1705_p4, %p1699_p13 }
  0x56   : > { %1709 = shalt.err (!%p1706_p6)
}
  0x57   : > { %1538 = dma.hbm_to_vmem [thread:$0]  (!%p1932_p5), %s2186_s0, 128, %s297_s28, [#allocation9]  }
  0x58   : > { %s1710_s12 = scalar_lea.hbm %s2190_s4, 16 }
  0x59   : > { %p1711_p8 = scmp.ne.s32.totalorder %s2190_s4, %s1710_s12  ;;  %p1717_p3 = scmp.lt.u32.totalorder %s1710_s12, %s2190_s4 }
  0x5b   : > { %p1713_p9 = pnand %p1711_p8, %p1945_p7 }
  0x5d   : > { %p1714_p2 = pneg %p1713_p9 }
  0x5f   : > { %p1719_p10 = pnand %p1717_p3, %p1714_p2 }
  0x61   : > { %1722 = shalt.err (!%p1719_p10)
}
  0x62   : > { %s1723_s26 = scalar_lea.vmem %s325_s11, 16  ;;  %s1730_s28 = scalar_lea.vmem %s325_s11, 32 }
  0x63   : > { %p1724_p11 = scmp.ne.s32.totalorder %s325_s11, %s1723_s26  ;;  %p1731_p0 = scmp.lt.s32.totalorder %s325_s11, %s325_s11 }
  0x64   : > { %p1732_p1 = scmp.lt.s32.totalorder %s1730_s28, %s1723_s26 }
  0x65   : > { %p1726_p12 = pnand %p1724_p11, %p1945_p7 }
  0x66   : > { %p1733_p4 = por %p1732_p1, %p1731_p0 }
  0x67   : > { %p1727_p13 = pneg %p1726_p12 }
  0x69   : > { %p1734_p6 = pnand %p1733_p4, %p1727_p13 }
  0x6b   : > { %1737 = shalt.err (!%p1734_p6)
}
  0x6c   : > { %1544 = dma.hbm_to_vmem [thread:$0]  (!%p1932_p5), %s2190_s4, 16, %s325_s11, [#allocation11]  }
  0x6d   : > { %s1840_s27 = smov [#allocation15]   ;;  %s1841_s12 = smov [#allocation16]  }
  0x6e   : > { %s348_s29 = sshll.u32 %s1840_s27, 4  ;;  %s361_s16 = sshll.u32 %s1841_s12, 4  ;;  %s349_s29 = int_to_ptr.vmem [resolvable:$true] %s348_s29  ;;  %s362_s16 = int_to_ptr.vmem [resolvable:$true] %s361_s16 }
  0x6f   : > { %s1738_s25 = scalar_lea.hbm %s2192_s6, 16 }
  0x70   : > { %p1739_p8 = scmp.ne.s32.totalorder %s2192_s6, %s1738_s25  ;;  %p1745_p3 = scmp.lt.u32.totalorder %s1738_s25, %s2192_s6 }
  0x72   : > { %p1741_p9 = pnand %p1739_p8, %p1945_p7 }
  0x74   : > { %p1742_p2 = pneg %p1741_p9 }
  0x76   : > { %p1747_p10 = pnand %p1745_p3, %p1742_p2 }
  0x78   : > { %1750 = shalt.err (!%p1747_p10)
}
  0x79   : > { %s1751_s11 = scalar_lea.vmem %s349_s29, 16  ;;  %s1758_s15 = scalar_lea.vmem %s349_s29, 32 }
  0x7a   : > { %p1752_p11 = scmp.ne.s32.totalorder %s349_s29, %s1751_s11  ;;  %p1759_p0 = scmp.lt.s32.totalorder %s349_s29, %s349_s29 }
  0x7b   : > { %p1760_p1 = scmp.lt.s32.totalorder %s1758_s15, %s1751_s11 }
  0x7c   : > { %p1754_p12 = pnand %p1752_p11, %p1945_p7 }
  0x7d   : > { %p1761_p4 = por %p1760_p1, %p1759_p0 }
  0x7e   : > { %p1755_p13 = pneg %p1754_p12 }
  0x80   : > { %p1762_p6 = pnand %p1761_p4, %p1755_p13 }
  0x82   : > { %1765 = shalt.err (!%p1762_p6)
}
  0x83   : > { %1550 = dma.hbm_to_vmem [thread:$0]  (!%p1932_p5), %s2192_s6, 16, %s349_s29, [#allocation14]  }
  0x84   : > { %s1766_s22 = scalar_lea.hbm %s2194_s8, 1024 }
  0x85   : > { %p1767_p8 = scmp.ne.s32.totalorder %s2194_s8, %s1766_s22  ;;  %p1773_p3 = scmp.lt.u32.totalorder %s1766_s22, %s2194_s8 }
  0x87   : > { %p1769_p9 = pnand %p1767_p8, %p1945_p7 }
  0x89   : > { %p1770_p2 = pneg %p1769_p9 }
  0x8b   : > { %p1775_p10 = pnand %p1773_p3, %p1770_p2 }
  0x8d   : > { %1778 = shalt.err (!%p1775_p10)
}
  0x8e   : > { %s1779_s11 = scalar_lea.vmem %s362_s16, 1024  ;;  %p1787_p0 = scmp.lt.s32.totalorder %s362_s16, %s362_s16 }
  0x8f   : > { %p1780_p11 = scmp.ne.s32.totalorder %s362_s16, %s1779_s11  ;;  %p1788_p1 = scmp.lt.s32.totalorder %s1779_s11, %s1779_s11 }
  0x91   : > { %p1782_p12 = pnand %p1780_p11, %p1945_p7  ;;  %p1789_p4 = por %p1788_p1, %p1787_p0 }
  0x93   : > { %p1783_p13 = pneg %p1782_p12 }
  0x95   : > { %p1790_p6 = pnand %p1789_p4, %p1783_p13 }
  0x97   : > { %1793 = shalt.err (!%p1790_p6)
}
  0x98   : > { %s2209_s29 = smov 64   ;;  %p2210_p8 = scmp.ne.s32.totalorder %s2205_s20, 0 }
  0x99   : > { %1553 = dma.hbm_to_vmem [thread:$0]  (!%p1932_p5), %s2194_s8, 1024, %s362_s16, [#allocation17], %s2209_s29, %s2209_s29, %s1837_s21  }
  0x9a   : > { %380 = sbr.rel (%p2210_p8) target bundleno = 973 (0x3cd), region = 60  ;;  %p2211_p7 = scmp.ne.s32.totalorder (!%p2210_p8), %s2204_s19, 0 }
  0xa1   : > { %1807 = dma.done.wait (%p2211_p7), [#allocation9], 128  }
  0xa2   : > { %1809 = vsyncadd (%p2211_p7), [#allocation9], 4294967168 }
  0xa3   : > { %1811 = dma.done.wait (%p2211_p7), [#allocation11], 32  }
  0xa4   : > { %1813 = vsyncadd (%p2211_p7), [#allocation11], 4294967264 }
  0xa5   : > { %1815 = dma.done.wait (%p2211_p7), [#allocation14], 1040  }
  0xa6   : > { %1817 = vsyncadd (%p2211_p7), [#allocation14], 4294966256 }
  0xa7   : > { %1819 = dma.done.wait (%p2211_p7), [#allocation17], 1024  }
  0xa8   : > { %1821 = vsyncadd (%p2211_p7), [#allocation17], 4294966272  ;;  %s437_s20 = ssub.s32 1, %s1824_s13  ;;  %p449_p5 = scmp.eq.s32.totalorder %s1824_s13, 0 }
  0xa9   : > { %s1313_s23 = sshll.u32 %s437_s20, 3  ;;  %v1601_v0 = vld [vmem:[%s2187_s1] sm:$0xff] (%p449_p5)   ;;  %v1842_v1 = vmov (%p449_p5), 0.0   ;;  %v1603_v3 = vld [vmem:[%s2187_s1 + $0x8] sm:$0xff] (%p449_p5)   ;;  %vm1843_vm0 = vmmov (%p449_p5), 0   ;;  %v455_v5 = vld [vmem:[#allocation8] sm:$0xff] (%p449_p5) }
  0xaa   : > { %p440_p9 = scmp.lt.s32.totalorder %s1313_s23, 15  ;;  %454 = sbr.rel (!%p449_p5) target bundleno = 433 (0x1b1), region = 88  ;;  %1415 = vmatprep.subr.bf16.mxu0 (%p449_p5), %v1842_v1  ;;  %621 = vst [vmem:[#allocation6] sm:$0x1] (%p449_p5), %v1842_v1  ;;  %622 = vst [vmem:[#allocation7] sm:$0x1] (%p449_p5), %v1842_v1  ;;  %1423 = vmatprep.subr.bf16.mxu1 (%p449_p5), %v1842_v1  ;;  %v456_v6 = vpack.c.bf16 (%p449_p5), %v455_v5, %v455_v5 }
  0xab   : > { %v1602_v2 = vld [vmem:[%s2188_s2] sm:$0xff] (%p449_p5)   ;;  %1416 = vmatpush3.bf16.msra.mxu0 (%p449_p5), %v1601_v0  ;;  %1419 = vmatprep.mubr.msk.bf16.mxu0 (%p449_p5), %vm1843_vm0, %v1842_v1  ;;  %v1604_v4 = vld [vmem:[%s2188_s2 + $0x8] sm:$0xff] (%p449_p5)   ;;  %vm473_vm1 = vcmask (%p449_p5), 261120   ;;  %v609_v53 = vld [vmem:[#allocation10] sm:$0x1] (%p449_p5) }
  0xac   : > { %s2218_s23 = smov (!%p440_p9, %s1313_s23), 15  ;;  %1424 = vmatpush3.bf16.msra.mxu1 (%p449_p5), %v1602_v2  ;;  %1417 = vmatprep.subr.bf16.mxu0 (%p449_p5), %v1842_v1  ;;  %v616_v56 = vld [vmem:[#allocation12] sm:$0x1] (%p449_p5) }
  0xad   : > { %s1314_s30 = sshll.u32 %s2218_s23, 2  ;;  %1425 = vmatprep.subr.bf16.mxu1 (%p449_p5), %v1842_v1  ;;  %1427 = vmatprep.mubr.msk.bf16.mxu1 (%p449_p5), %vm1843_vm0, %v1842_v1 }
  0xae   : > { %s2091_s12 = scalar_lea.vmem %s2196_s10, %s1314_s30 }
  0xaf   : > { %1418 = vmatpush3.bf16.msra.mxu0 (%p449_p5), %v1603_v3 }
  0xb0   : > { %1426 = vmatpush3.bf16.msra.mxu1 (%p449_p5), %v1604_v4 }
  0xb2   : > { %1420 = vmatmul.mubr.msk.bf16.vlgmr.msra.gmra.mrb[0].mxu0 %vm473_vm1, %v456_v6 }
  0xb3   : > { %1428 = vmatmul.mubr.msk.bf16.vlgmr.msra.gmra.mrb[0].mxu1 %vm473_vm1, %v456_v6 }
 0x185   : > { %v511_v7 = vpop.f32.mrb[0].mxu0 }
 0x186   : > { %573 = vst [vmem:[#allocation2] sm:$0xff] %v511_v7  ;;  %v575_v8 = vrot.slane %v511_v7, 4  ;;  %v589_v9 = vmul.f32 %v511_v7, %v511_v7  ;;  %v567_v10 = vpop.f32.mrb[0].mxu1  ;;  %v1421_v11 = vpop.f32.mrb[1].mxu0 }
 0x187   : > { %574 = vst [vmem:[#allocation3] sm:$0xff] %v567_v10  ;;  %v582_v12 = vrot.slane %v567_v10, 4  ;;  %v599_v13 = vmul.f32 %v567_v10, %v567_v10  ;;  %v1429_v14 = vpop.f32.mrb[1].mxu1  ;;  %v514_v15 = vpop.f32.mrb[2].mxu0 }
 0x188   : > { %v576_v16 = vadd.f32 %v575_v8, %v511_v7  ;;  %v590_v17 = vrot.slane %v589_v9, 4  ;;  %v570_v18 = vpop.f32.mrb[2].mxu1  ;;  %v1422_v19 = vpop.f32.mrb[3].mxu0 }
 0x189   : > { %v583_v20 = vadd.f32 %v582_v12, %v567_v10  ;;  %v600_v21 = vrot.slane %v599_v13, 4  ;;  %v1430_v22 = vpop.f32.mrb[3].mxu1 }
 0x18a   : > { %v577_v23 = vrot.slane %v576_v16, 2  ;;  %v591_v24 = vadd.f32 %v590_v17, %v589_v9 }
 0x18b   : > { %v584_v25 = vrot.slane %v583_v20, 2  ;;  %v601_v26 = vadd.f32 %v600_v21, %v599_v13 }
 0x18c   : > { %v578_v27 = vadd.f32 %v577_v23, %v576_v16  ;;  %v592_v28 = vrot.slane %v591_v24, 2 }
 0x18d   : > { %v585_v29 = vadd.f32 %v584_v25, %v583_v20  ;;  %v602_v30 = vrot.slane %v601_v26, 2 }
 0x18e   : > { %v579_v31 = vrot.slane %v578_v27, 1  ;;  %v593_v32 = vadd.f32 %v592_v28, %v591_v24 }
 0x18f   : > { %v586_v33 = vrot.slane %v585_v29, 1  ;;  %v603_v34 = vadd.f32 %v602_v30, %v601_v26 }
 0x190   : > { %v580_v35 = vadd.f32 %v579_v31, %v578_v27  ;;  %v594_v36 = vrot.slane %v593_v32, 1 }
 0x191   : > { %v587_v37 = vadd.f32 %v586_v33, %v585_v29  ;;  %v604_v38 = vrot.slane %v603_v34, 1 }
 0x192   : > { %v581_v39 = vmul.f32 0.125, %v580_v35  ;;  %v595_v40 = vadd.f32 %v594_v36, %v593_v32 }
 0x193   : > { %v588_v41 = vmul.f32 0.125, %v587_v37  ;;  %v605_v42 = vadd.f32 %v604_v38, %v603_v34 }
 0x194   : > { %v596_v43 = vmul.f32 0.125, %v595_v40  ;;  %v597_v44 = vmul.f32 %v581_v39, %v581_v39 }
 0x195   : > { %v606_v45 = vmul.f32 0.125, %v605_v42  ;;  %v607_v46 = vmul.f32 %v588_v41, %v588_v41  ;;  %v617_v47 = vadd.f32 %v588_v41, %v581_v39 }
 0x196   : > { %v598_v48 = vsub.f32 %v596_v43, %v597_v44 }
 0x197   : > { %v608_v49 = vsub.f32 %v606_v45, %v607_v46 }
 0x199   : > { %v610_v50 = vadd.f32 %v608_v49, %v598_v48 }
 0x19b   : > { %v611_v51 = vmax.f32 %v610_v50, 0.0 }
 0x19d   : > { %v612_v52 = vadd.f32 1e-05, %v611_v51 }
 0x19f   : > { %1605 = vrsqrt.f32 %v612_v52 }
 0x1a9   : > { %v1606_v54 = vpop.eup %1605 }
 0x1aa   : > { %v614_v55 = vmul.f32 %v1606_v54, %v609_v53 }
 0x1ac   : > { %615 = vst [vmem:[#allocation4] sm:$0x1] %v614_v55  ;;  %v618_v57 = vmul.f32 %v617_v47, %v614_v55 }
 0x1ae   : > { %v619_v58 = vsub.f32 %v616_v56, %v618_v57 }
 0x1b0   : > { %620 = vst [vmem:[#allocation5] sm:$0x1] %v619_v58 }
 0x1b1 PF: > { %v1607_v59 = vld [vmem:[#allocation13] sm:$0xff]   ;;  %v1608_v60 = vld [vmem:[#allocation13 + $0x8] sm:$0xff]   ;;  %v1609_v61 = vld [vmem:[#allocation13 + $0x10] sm:$0xff]   ;;  %v631_v62 = vlaneseq  ;;  %v1844_v1 = vmov 1966171168   ;;  %p1332_p2 = scmp.ne.s32.totalorder %s1824_s13, 0 }
 0x1b2   : > { %1431 = vmatprep.subr.bf16.mxu0 %v1607_v59  ;;  %1479 = vmatprep.subr.bf16.mxu1 %v1607_v59  ;;  %v1610_v63 = vld [vmem:[#allocation13 + $0x18] sm:$0xff]   ;;  %v625_v0 = vld [vmem:[#allocation2] sm:$0xff]  ;;  %v629_v2 = vunpack.c.l.s4 %v1844_v1  ;;  %v1612_v11 = vld [vmem:[#allocation13 + $0x28] sm:$0xff]  }
 0x1b3   : > { %1432 = vmatpush3.bf16.msra.mxu0 %v1607_v59  ;;  %1487 = vmatpush3.bf16.msra.mxu1 %v1607_v59  ;;  %v632_v3 = vshrl.u32 %v631_v62, 7  ;;  %v627_v5 = vcombine.high %v625_v0, %v625_v0  ;;  %v1611_v6 = vld [vmem:[#allocation13 + $0x20] sm:$0xff]   ;;  %v676_v16 = vld [vmem:[#allocation3] sm:$0xff]  ;;  %v1613_v20 = vld [vmem:[#allocation13 + $0x30] sm:$0xff]  }
 0x1b4   : > { %1433 = vmatprep.subr.bf16.mxu0 %v1608_v60  ;;  %1480 = vmatprep.subr.bf16.mxu1 %v1608_v60  ;;  %v630_v4 = vunpack.c.0.s8 %v629_v2  ;;  %v1322_v21 = vld [vmem:[#allocation4] ss:$0 sm:$0xff]  ;;  %v1614_v37 = vld [vmem:[#allocation13 + $0x38] sm:$0xff]  }
 0x1b5   : > { %v2105_v9 = vsub.s32 0, %v632_v3 }
 0x1b6   : > { %v633_v7 = vsub.s32 %v630_v4, %v632_v3 }
 0x1b7   : > { %1434 = vmatpush3.bf16.msra.mxu0 %v1608_v60  ;;  %1488 = vmatpush3.bf16.msra.mxu1 %v1608_v60  ;;  %v1323_v29 = vld [vmem:[#allocation5] ss:$0 sm:$0xff] }
 0x1b8   : > { %1435 = vmatprep.subr.bf16.mxu0 %v1609_v61  ;;  %1481 = vmatprep.subr.bf16.mxu1 %v1609_v61  ;;  %v634_v8 = vrot.slane %v625_v0, %v633_v7  ;;  %v641_v10 = vrot.slane %v627_v5, %v633_v7 }
 0x1ba   : > { %v642_v12 = vcombine.high %v634_v8, %v634_v8  ;;  %v650_v13 = vrot.slane %v634_v8, %v633_v7  ;;  %v643_v14 = vcombine.high %v641_v10, %v641_v10  ;;  %v657_v15 = vrot.slane %v641_v10, %v633_v7 }
 0x1bb   : > { %1436 = vmatpush3.bf16.msra.mxu0 %v1609_v61  ;;  %1489 = vmatpush3.bf16.msra.mxu1 %v1609_v61 }
 0x1bc   : > { %1437 = vmatprep.subr.bf16.mxu0 %v1610_v63  ;;  %1482 = vmatprep.subr.bf16.mxu1 %v1610_v63  ;;  %v664_v17 = vrot.slane %v642_v12, %v633_v7  ;;  %v672_v18 = vcombine.high %v650_v13, %v650_v13  ;;  %v680_v19 = vrot.slane %v650_v13, %v2105_v9 }
 0x1bd   : > { %v671_v22 = vrot.slane %v643_v14, %v633_v7  ;;  %v673_v23 = vcombine.high %v657_v15, %v657_v15  ;;  %v696_v24 = vrot.slane %v657_v15, %v2105_v9 }
 0x1be   : > { %v674_v25 = vcombine.high %v664_v17, %v664_v17  ;;  %v684_v26 = vrot.slane %v664_v17, %v2105_v9  ;;  %v717_v27 = vadd.f32 %v680_v19, %v676_v16  ;;  %v688_v28 = vrot.slane %v672_v18, %v2105_v9 }
 0x1bf   : > { %1438 = vmatpush3.bf16.msra.mxu0 %v1610_v63  ;;  %1490 = vmatpush3.bf16.msra.mxu1 %v1610_v63  ;;  %v675_v30 = vcombine.high %v671_v22, %v671_v22  ;;  %v700_v31 = vrot.slane %v671_v22, %v2105_v9  ;;  %v721_v32 = vadd.f32 %v696_v24, %v676_v16 }
 0x1c0   : > { %1439 = vmatprep.subr.bf16.mxu0 %v1611_v6  ;;  %1483 = vmatprep.subr.bf16.mxu1 %v1611_v6  ;;  %v704_v33 = vrot.slane %v673_v23, %v2105_v9  ;;  %v718_v34 = vadd.f32 %v684_v26, %v676_v16  ;;  %v732_v35 = vmul.f32 %v1322_v21, %v717_v27 }
 0x1c1   : > { %v692_v36 = vrot.slane %v674_v25, %v2105_v9  ;;  %v722_v38 = vadd.f32 %v700_v31, %v676_v16  ;;  %v736_v39 = vmul.f32 %v1322_v21, %v721_v32  ;;  %v719_v40 = vadd.f32 %v688_v28, %v676_v16 }
 0x1c2   : > { %v733_v41 = vmul.f32 %v1322_v21, %v718_v34  ;;  %v747_v42 = vadd.f32 %v1323_v29, %v732_v35  ;;  %v708_v44 = vrot.slane %v675_v30, %v2105_v9  ;;  %v723_v48 = vadd.f32 %v704_v33, %v676_v16 }
 0x1c3   : > { %1440 = vmatpush3.bf16.msra.mxu0 %v1611_v6  ;;  %1491 = vmatpush3.bf16.msra.mxu1 %v1611_v6  ;;  %v720_v43 = vadd.f32 %v692_v36, %v676_v16  ;;  %v737_v45 = vmul.f32 %v1322_v21, %v722_v38  ;;  %v751_v46 = vadd.f32 %v1323_v29, %v736_v39 }
 0x1c4   : > { %1441 = vmatprep.subr.bf16.mxu0 %v1612_v11  ;;  %1484 = vmatprep.subr.bf16.mxu1 %v1612_v11  ;;  %v734_v47 = vmul.f32 %v1322_v21, %v719_v40  ;;  %v748_v49 = vadd.f32 %v1323_v29, %v733_v41  ;;  %v755_v50 = vmax.f32 %v747_v42, 0.0  ;;  %v724_v52 = vadd.f32 %v708_v44, %v676_v16 }
 0x1c5   : > { %v735_v51 = vmul.f32 %v1322_v21, %v720_v43  ;;  %v752_v53 = vadd.f32 %v1323_v29, %v737_v45  ;;  %v759_v54 = vmax.f32 %v751_v46, 0.0  ;;  %v738_v56 = vmul.f32 %v1322_v21, %v723_v48 }
 0x1c6   : > { %v749_v55 = vadd.f32 %v1323_v29, %v734_v47  ;;  %v756_v57 = vmax.f32 %v748_v49, 0.0  ;;  %v739_v59 = vmul.f32 %v1322_v21, %v724_v52  ;;  %v899_v47 = vld [vmem:[#allocation6] sm:$0x1] (!%p1332_p2) }
 0x1c7   : > { %1442 = vmatpush3.bf16.msra.mxu0 %v1612_v11  ;;  %1492 = vmatpush3.bf16.msra.mxu1 %v1612_v11  ;;  %v750_v58 = vadd.f32 %v1323_v29, %v735_v51  ;;  %v760_v60 = vmax.f32 %v752_v53, 0.0  ;;  %v753_v62 = vadd.f32 %v1323_v29, %v738_v56 }
 0x1c8   : > { %1443 = vmatprep.subr.bf16.mxu0 %v1613_v20  ;;  %1485 = vmatprep.subr.bf16.mxu1 %v1613_v20  ;;  %v757_v61 = vmax.f32 %v749_v55, 0.0  ;;  %v763_v63 = vpack.c.bf16 %v756_v57, %v755_v50  ;;  %v754_v1 = vadd.f32 %v1323_v29, %v739_v59  ;;  %v915_v50 = vld [vmem:[#allocation7] sm:$0x1] (!%p1332_p2) }
 0x1c9   : > { %v758_v0 = vmax.f32 %v750_v58, 0.0  ;;  %v765_v2 = vpack.c.bf16 %v760_v60, %v759_v54  ;;  %v761_v3 = vmax.f32 %v753_v62, 0.0 }
 0x1ca   : > { %1447 = vmatprep.mubr.bf16.mxu0 %v763_v63  ;;  %v762_v5 = vmax.f32 %v754_v1, 0.0 }
 0x1cb   : > { %1444 = vmatpush3.bf16.msra.mxu0 %v1613_v20  ;;  %1493 = vmatpush3.bf16.msra.mxu1 %v1613_v20  ;;  %v764_v4 = vpack.c.bf16 %v758_v0, %v757_v61 }
 0x1cc   : > { %1445 = vmatprep.subr.bf16.mxu0 %v1614_v37  ;;  %1486 = vmatprep.subr.bf16.mxu1 %v1614_v37  ;;  %v766_v6 = vpack.c.bf16 %v762_v5, %v761_v3 }
 0x1cd   : > { %1451 = vmatprep.mubr.bf16.mxu1 %v765_v2 }
 0x1cf   : > { %1446 = vmatpush3.bf16.msra.mxu0 %v1614_v37  ;;  %1494 = vmatpush3.bf16.msra.mxu1 %v1614_v37 }
 0x1d2   : > { %1448 = vmatmul.mubr.bf16.vlgmr.msra.gmra.mrb[0].mxu0 %v764_v4  ;;  %1452 = vmatmul.mubr.bf16.vlgmr.msra.gmra.mrb[0].mxu1 %v766_v6 }
 0x2a2   : > { %898 = sbr.rel (%p1332_p2) target bundleno = 712 (0x2c8), region = 92 }
 0x2a5   : > { %v2115_v7 = vpop.f32.mrb[0].mxu0  ;;  %v2119_v10 = vpop.f32.mrb[0].mxu1 }
 0x2a6   : > { %v2117_v8 = vpop.f32.mrb[1].mxu0  ;;  %v2123_v12 = vpop.f32.mrb[1].mxu1  ;;  %v918_v19 = vmul.f32 (!%p1332_p2), %v2115_v7, %v2115_v7  ;;  %v922_v30 = vmul.f32 (!%p1332_p2), %v2119_v10, %v2119_v10 }
 0x2a7   : > { %v2121_v11 = vpop.f32.mrb[2].mxu0  ;;  %v2127_v14 = vpop.f32.mrb[2].mxu1  ;;  %v916_v17 = vmul.f32 (!%p1332_p2), %v2117_v8, %v2117_v8  ;;  %v920_v24 = vmul.f32 (!%p1332_p2), %v2123_v12, %v2123_v12 }
 0x2a8   : > { %v2125_v13 = vpop.f32.mrb[3].mxu0  ;;  %v2129_v15 = vpop.f32.mrb[3].mxu1  ;;  %v919_v21 = vmul.f32 (!%p1332_p2), %v2121_v11, %v2121_v11  ;;  %v923_v33 = vmul.f32 (!%p1332_p2), %v2127_v14, %v2127_v14 }
 0x2a9   : > { %v900_v16 = vadd.f32 %v2125_v13, %v2117_v8  ;;  %v917_v18 = vmul.f32 %v2125_v13, %v2125_v13  ;;  %v921_v27 = vmul.f32 %v2129_v15, %v2129_v15 }
 0x2ab   : > { %v901_v20 = vadd.f32 %v2115_v7, %v900_v16  ;;  %v924_v22 = vadd.f32 %v917_v18, %v916_v17 }
 0x2ad   : > { %v902_v23 = vadd.f32 %v2121_v11, %v901_v20  ;;  %v925_v25 = vadd.f32 %v924_v22, %v918_v19 }
 0x2af   : > { %v903_v26 = vadd.f32 %v902_v23, %v2123_v12  ;;  %v926_v28 = vadd.f32 %v925_v25, %v919_v21 }
 0x2b1   : > { %v904_v29 = vadd.f32 %v903_v26, %v2129_v15  ;;  %v927_v31 = vadd.f32 %v926_v28, %v920_v24 }
 0x2b3   : > { %v905_v32 = vadd.f32 %v2119_v10, %v904_v29  ;;  %v928_v34 = vadd.f32 %v927_v31, %v921_v27 }
 0x2b5   : > { %v906_v35 = vadd.f32 %v2127_v14, %v905_v32  ;;  %v929_v36 = vadd.f32 %v928_v34, %v922_v30 }
 0x2b7   : > { %v907_v37 = vrot.slane %v906_v35, 4  ;;  %v930_v38 = vadd.f32 %v929_v36, %v923_v33 }
 0x2b9   : > { %v908_v39 = vadd.f32 %v907_v37, %v906_v35  ;;  %v931_v40 = vrot.slane %v930_v38, 4 }
 0x2bb   : > { %v909_v41 = vrot.slane %v908_v39, 2  ;;  %v932_v42 = vadd.f32 %v931_v40, %v930_v38 }
 0x2bd   : > { %v910_v43 = vadd.f32 %v909_v41, %v908_v39  ;;  %v933_v44 = vrot.slane %v932_v42, 2 }
 0x2bf   : > { %v911_v45 = vrot.slane %v910_v43, 1  ;;  %v934_v46 = vadd.f32 %v933_v44, %v932_v42 }
 0x2c1   : > { %v912_v48 = vadd.f32 %v911_v45, %v910_v43  ;;  %v935_v49 = vrot.slane %v934_v46, 1 }
 0x2c3   : > { %v913_v51 = vadd.f32 %v912_v48, %v899_v47  ;;  %v936_v52 = vadd.f32 %v935_v49, %v934_v46 }
 0x2c5   : > { %914 = vst [vmem:[#allocation6] sm:$0x1] %v913_v51  ;;  %v937_v53 = vadd.f32 %v936_v52, %v915_v50 }
 0x2c7   : > { %938 = vst [vmem:[#allocation7] sm:$0x1] %v937_v53 }
 0x2c8 PF: > { %p1333_p3 = scmp.ne.s32.totalorder %s1824_s13, 1 }
 0x2c9   : > { %v1616_v54 = vld [vmem:[#allocation16] sm:$0xff] (!%p1333_p3)   ;;  %v1617_v55 = vld [vmem:[#allocation16 + $0x8] sm:$0xff] (!%p1333_p3)   ;;  %v1618_v56 = vld [vmem:[#allocation16 + $0x10] sm:$0xff] (!%p1333_p3)  }
 0x2ca   : > { %942 = sbr.rel (%p1333_p3) target bundleno = 973 (0x3cd), region = 96  ;;  %1455 = vmatprep.subr.bf16.mxu0 (!%p1333_p3), %v1616_v54  ;;  %1495 = vmatprep.subr.bf16.mxu1 (!%p1333_p3), %v1616_v54  ;;  %v1619_v57 = vld [vmem:[#allocation16 + $0x18] sm:$0xff] (!%p1333_p3)   ;;  %v1620_v63 = vld [vmem:[#allocation16 + $0x20] sm:$0xff] (!%p1333_p3)   ;;  %v1621_v2 = vld [vmem:[#allocation16 + $0x28] sm:$0xff] (!%p1333_p3)  }
 0x2cb   : > { %1456 = vmatpush3.bf16.msra.mxu0 (!%p1333_p3), %v1616_v54  ;;  %1503 = vmatpush3.bf16.msra.mxu1 (!%p1333_p3), %v1616_v54  ;;  %v1622_v4 = vld [vmem:[#allocation16 + $0x30] sm:$0xff] (!%p1333_p3)   ;;  %v1623_v5 = vld [vmem:[#allocation16 + $0x38] sm:$0xff] (!%p1333_p3)  }
 0x2cc   : > { %1457 = vmatprep.subr.bf16.mxu0 (!%p1333_p3), %v1617_v55  ;;  %1496 = vmatprep.subr.bf16.mxu1 (!%p1333_p3), %v1617_v55  ;;  %v943_v58 = vld [vmem:[#allocation6] sm:$0x1] (!%p1333_p3)  ;;  %v950_v6 = vld [vmem:[#allocation15] sm:$0x1] (!%p1333_p3) }
 0x2cd   : > { %v944_v60 = vmul.f32 (!%p1333_p3), 0.015625, %v943_v58  ;;  %v954_v18 = vld [vmem:[%s2193_s7] sm:$0x1] (!%p1333_p3) }
 0x2ce   : > { %v945_v59 = vld [vmem:[#allocation7] sm:$0x1] (!%p1333_p3)  ;;  %v1334_v43 = vld [vmem:[%s2195_s9] ss:$0 sm:$0xff] (!%p1333_p3) }
 0x2cf   : > { %1458 = vmatpush3.bf16.msra.mxu0 (!%p1333_p3), %v1617_v55  ;;  %1504 = vmatpush3.bf16.msra.mxu1 (!%p1333_p3), %v1617_v55  ;;  %v946_v61 = vmul.f32 (!%p1333_p3), 0.015625, %v945_v59  ;;  %v947_v62 = vmul.f32 (!%p1333_p3), %v944_v60, %v944_v60 }
 0x2d0   : > { %1459 = vmatprep.subr.bf16.mxu0 (!%p1333_p3), %v1618_v56  ;;  %1497 = vmatprep.subr.bf16.mxu1 (!%p1333_p3), %v1618_v56 }
 0x2d1   : > { %v948_v0 = vsub.f32 %v946_v61, %v947_v62 }
 0x2d3   : > { %1460 = vmatpush3.bf16.msra.mxu0 %v1618_v56  ;;  %1505 = vmatpush3.bf16.msra.mxu1 %v1618_v56  ;;  %v949_v1 = vmax.f32 %v948_v0, 0.0 }
 0x2d4   : > { %1461 = vmatprep.subr.bf16.mxu0 %v1619_v57  ;;  %1498 = vmatprep.subr.bf16.mxu1 %v1619_v57 }
 0x2d5   : > { %v951_v3 = vadd.f32 1e-05, %v949_v1 }
 0x2d7   : > { %1462 = vmatpush3.bf16.msra.mxu0 %v1619_v57  ;;  %1506 = vmatpush3.bf16.msra.mxu1 %v1619_v57  ;;  %1624 = vrsqrt.f32 %v951_v3 }
 0x2d8   : > { %1463 = vmatprep.subr.bf16.mxu0 %v1620_v63  ;;  %1499 = vmatprep.subr.bf16.mxu1 %v1620_v63 }
 0x2db   : > { %1464 = vmatpush3.bf16.msra.mxu0 %v1620_v63  ;;  %1507 = vmatpush3.bf16.msra.mxu1 %v1620_v63 }
 0x2dc   : > { %1465 = vmatprep.subr.bf16.mxu0 %v1621_v2  ;;  %1500 = vmatprep.subr.bf16.mxu1 %v1621_v2 }
 0x2df   : > { %1466 = vmatpush3.bf16.msra.mxu0 %v1621_v2  ;;  %1508 = vmatpush3.bf16.msra.mxu1 %v1621_v2 }
 0x2e0   : > { %1467 = vmatprep.subr.bf16.mxu0 %v1622_v4  ;;  %1501 = vmatprep.subr.bf16.mxu1 %v1622_v4 }
 0x2e1   : > { %v1625_v16 = vpop.eup %1624 }
 0x2e2   : > { %v953_v17 = vmul.f32 %v1625_v16, %v950_v6 }
 0x2e3   : > { %1468 = vmatpush3.bf16.msra.mxu0 %v1622_v4  ;;  %1509 = vmatpush3.bf16.msra.mxu1 %v1622_v4 }
 0x2e4   : > { %1469 = vmatprep.subr.bf16.mxu0 %v1623_v5  ;;  %1502 = vmatprep.subr.bf16.mxu1 %v1623_v5  ;;  %v955_v19 = vmul.f32 %v953_v17, %v944_v60  ;;  %v961_v20 = vrot.slane %v953_v17, %v2105_v9 }
 0x2e6   : > { %v956_v21 = vsub.f32 %v954_v18, %v955_v19  ;;  %v963_v22 = vmul.f32 %v961_v20, %v2117_v8  ;;  %v964_v23 = vmul.f32 %v961_v20, %v2125_v13  ;;  %v967_v24 = vmul.f32 %v961_v20, %v2123_v12 }
 0x2e7   : > { %1470 = vmatpush3.bf16.msra.mxu0 %v1623_v5  ;;  %1510 = vmatpush3.bf16.msra.mxu1 %v1623_v5  ;;  %v968_v25 = vmul.f32 %v961_v20, %v2129_v15  ;;  %v965_v26 = vmul.f32 %v2115_v7, %v961_v20  ;;  %v966_v27 = vmul.f32 %v2121_v11, %v961_v20 }
 0x2e8   : > { %v969_v28 = vmul.f32 %v2119_v10, %v961_v20  ;;  %v975_v29 = vrot.slane %v956_v21, %v2105_v9  ;;  %v970_v30 = vmul.f32 %v2127_v14, %v961_v20 }
 0x2ea   : > { %v977_v31 = vadd.f32 %v975_v29, %v963_v22  ;;  %v978_v32 = vadd.f32 %v975_v29, %v964_v23  ;;  %v981_v33 = vadd.f32 %v975_v29, %v967_v24  ;;  %v982_v8 = vadd.f32 %v975_v29, %v968_v25 }
 0x2eb   : > { %v979_v34 = vadd.f32 %v975_v29, %v965_v26  ;;  %v980_v13 = vadd.f32 %v975_v29, %v966_v27  ;;  %v983_v35 = vadd.f32 %v975_v29, %v969_v28  ;;  %v984_v12 = vadd.f32 %v975_v29, %v970_v30 }
 0x2ec   : > { %v985_v36 = vmax.f32 %v977_v31, 0.0  ;;  %v986_v15 = vmax.f32 %v978_v32, 0.0  ;;  %v989_v37 = vmax.f32 %v981_v33, 0.0  ;;  %v990_v7 = vmax.f32 %v982_v8, 0.0 }
 0x2ed   : > { %v987_v38 = vmax.f32 %v979_v34, 0.0  ;;  %v988_v11 = vmax.f32 %v980_v13, 0.0  ;;  %v991_v39 = vmax.f32 %v983_v35, 0.0  ;;  %v992_v10 = vmax.f32 %v984_v12, 0.0 }
 0x2ee   : > { %v993_v40 = vpack.c.bf16 %v986_v15, %v985_v36  ;;  %v995_v9 = vpack.c.bf16 %v990_v7, %v989_v37 }
 0x2ef   : > { %v994_v41 = vpack.c.bf16 %v988_v11, %v987_v38  ;;  %v996_v14 = vpack.c.bf16 %v992_v10, %v991_v39 }
 0x2f0   : > { %1471 = vmatprep.mubr.bf16.mxu0 %v993_v40  ;;  %1475 = vmatprep.mubr.bf16.mxu1 %v995_v9 }
 0x2f1   : > { %1472 = vmatmul.mubr.bf16.vlgmr.msra.gmra.mrb[0].mxu0 %v994_v41  ;;  %1476 = vmatmul.mubr.bf16.vlgmr.msra.gmra.mrb[0].mxu1 %v996_v14 }
 0x3c4   : > { %v1473_v42 = vpop.f32.mrb[0].mxu0  ;;  %v1477_v44 = vpop.f32.mrb[0].mxu1 }
 0x3c5   : > { %v1102_v45 = vpop.f32.mrb[1].mxu0  ;;  %v1118_v46 = vpop.f32.mrb[1].mxu1  ;;  %v1111_v49 = vadd.f32 %v1473_v42, %v1334_v43  ;;  %v1127_v50 = vadd.f32 %v1477_v44, %v1334_v43 }
 0x3c6   : > { %v1474_v47 = vpop.f32.mrb[2].mxu0  ;;  %v1478_v48 = vpop.f32.mrb[2].mxu1  ;;  %v1103_v55 = vadd.f32 %v1334_v43, %v1102_v45  ;;  %v1119_v56 = vadd.f32 %v1334_v43, %v1118_v46 }
 0x3c7   : > { %v1114_v51 = vadd.f32 %v1474_v47, %v1334_v43  ;;  %v1130_v52 = vadd.f32 %v1478_v48, %v1334_v43  ;;  %v1105_v53 = vpop.f32.mrb[3].mxu0  ;;  %v1121_v54 = vpop.f32.mrb[3].mxu1 }
 0x3c8   : > { %v1106_v57 = vadd.f32 %v1334_v43, %v1105_v53  ;;  %v1122_v58 = vadd.f32 %v1334_v43, %v1121_v54 }
 0x3c9   : > { %v1370_v59 = vpack.c.bf16 %v1114_v51, %v1111_v49  ;;  %v1380_v60 = vpack.c.bf16 %v1130_v52, %v1127_v50 }
 0x3ca   : > { %v1365_v61 = vpack.c.bf16 %v1106_v57, %v1103_v55  ;;  %v1375_v62 = vpack.c.bf16 %v1122_v58, %v1119_v56 }
 0x3cb   : > { %1382 = vst [vmem:[%s2091_s12 + $0x8] sm:$0xff] %v1370_v59   ;;  %1384 = vst [vmem:[%s2091_s12 + $0x18] sm:$0xff] %v1380_v60  }
 0x3cc   : > { %1366 = vst [vmem:[%s2091_s12] sm:$0xff] %v1365_v61   ;;  %1383 = vst [vmem:[%s2091_s12 + $0x10] sm:$0xff] %v1375_v62  }
 0x3cd PF: > { %s2212_s27 = sld [smem:[#allocation22_spill]]  ;;  %s2213_s13 = smov %s1828_s14 }
 0x3ce   : > { %s2214_s14 = smov %s2216_s24 }
 0x3d3   : > { %s24_s15 = sadd.s32 1, %s2212_s27  }
 0x3d4   : > { %p21_p10 = scmp.ge.s32.totalorder %s24_s15, 4  }
 0x3d6   :  { %23 = sbr.rel (!%p21_p10) target bundleno = 7 (0x7), region = 125 }
 0x3dd   :  { %1204 = vsyncpa [#allocation9], 1 }
 0x3de   :  { %1206 = vsyncpa [#allocation9 + $0x1], 1 }
 0x3df   :  { %1207 = vsyncpa [#allocation11], 1 }
 0x3e0   :  { %1208 = vsyncpa [#allocation14], 1 }
 0x3e1   :  { %1209 = vsyncpa [#allocation17], 1 }

</bundles_post_ra>
